<compile_context>
chip_gen: v7x
topology: tpu7x:2x2x1
jax: 0.10.0
libtpu: 0.0.40
codegen_flags: <defaults>
</compile_context>

<pallas_src>
import numpy as np
import jax
import jax.numpy as jnp
from jax import lax
from jax.experimental import pallas as pl
from jax.experimental.pallas import tpu as pltpu


def confmat_kernel(labels_ref,   # (tn, m*k)  has_labels-masked labels tile
                   logsm_ref,    # (tn, k)    log-softmax tile (f32)
                   w_ref,        # (k, m*k)   copy-rate-folded confusion weights
                   out_ref):     # (8, m*k)   per-tile partial sums (row 0)
    mk = labels_ref.shape[1]

    labels = labels_ref[...].astype(jnp.float32)                    # (tn, mk)
    preds_true = jnp.exp(logsm_ref[...])                            # (tn, k)

    # One wide MXU matmul: every labeller's cr-mixed prediction at once.
    preds_user = jnp.dot(preds_true, w_ref[...],
                         preferred_element_type=jnp.float32)        # (tn, mk)
    clipped = jnp.clip(preds_user, 1e-10, 0.9999999)

    loss = -labels * jnp.log(clipped)                               # (tn, mk)

    # Reduce only over the sublane/row axis (vreg accumulation on the VPU);
    # the cross-lane / cross-tile reduction is done by the wrapper's jnp.sum.
    col = jnp.sum(loss, axis=0, keepdims=True)                      # (1, mk)
    sub = lax.broadcasted_iota(jnp.int32, (8, mk), 0)
    out_ref[...] = jnp.where(sub == 0, col, jnp.float32(0.0))


def conf_mat_forward(labels, logsoftmax, b, theta, *, tn_max=16384):
    """labels: (n, m, k) [f32 or bf16], logsoftmax: (n, k),
    b: (m, k, k), theta: (m,). Returns the scalar mean loss."""
    n, m, k = labels.shape
    mk = m * k

    # ---- tiny O(m*k*k) parameter prologue (wrapper-side) --------------------
    rho = jax.nn.softplus(b.astype(jnp.float32))
    cm = rho / jnp.sum(rho, axis=-1, keepdims=True)                  # (m, k, k)
    cr = jax.nn.sigmoid(theta.astype(jnp.float32))                   # (m,)
    # For i == 0 the fold already reduces to cm[0] (no special case needed).
    w = cr[:, None, None] * cm[0:1] + (1.0 - cr)[:, None, None] * cm
    w_wide = jnp.transpose(w, (1, 0, 2)).reshape(k, mk)              # (k, m*k)

    # ---- has_labels mask folded into the labels (no-op for one-hot labels) --
    has = jnp.sum(labels, axis=-1, keepdims=True)
    labels2d = (labels * has).reshape(n, mk)                         # (n, m*k)
    logsm = logsoftmax.astype(jnp.float32)

    # ---- n tiling with a generation-safe VMEM budget -------------------------
    def rup(a, p):
        return -(-a // p) * p

    pack = 16                                  # sublane-safe for f32 and bf16
    lane_lab = rup(mk, 128)                    # VMEM lane padding of blocks
    lane_log = rup(k, 128)
    bytes_per_row = 2 * (lane_lab * labels2d.dtype.itemsize + lane_log * 4)
    vmem_block_budget = 24 * 1024 * 1024       # double-buffered input blocks
    tn_cap = max(pack, (vmem_block_budget // bytes_per_row) // pack * pack)
    tn = int(min(tn_max, tn_cap, rup(n, pack)))
    tn = max(pack, (tn // pack) * pack)
    n_pad = rup(rup(n, pack), tn)
    if n_pad != n:
        labels2d = jnp.pad(labels2d, ((0, n_pad - n), (0, 0)))
        logsm = jnp.pad(logsm, ((0, n_pad - n), (0, 0)))
    num_tiles = n_pad // tn

    grid_spec = pltpu.PrefetchScalarGridSpec(
        num_scalar_prefetch=0,
        grid=(num_tiles,),
        in_specs=[
            pl.BlockSpec((tn, mk), lambda i: (i, 0)),     # labels tile
            pl.BlockSpec((tn, k), lambda i: (i, 0)),      # log-softmax tile
            pl.BlockSpec((k, mk), lambda i: (0, 0)),      # folded weights
        ],
        out_specs=pl.BlockSpec((8, mk), lambda i: (i, 0)),
    )

    cost = pl.CostEstimate(
        flops=2 * n_pad * k * mk + 4 * n_pad * mk,
        transcendentals=n_pad * (k + mk),
        bytes_accessed=int(labels2d.size) * labels2d.dtype.itemsize
        + int(logsm.size) * 4 + int(w_wide.size) * 4
        + num_tiles * 8 * mk * 4,
    )

    partials = pl.pallas_call(
        confmat_kernel,
        out_shape=jax.ShapeDtypeStruct((num_tiles * 8, mk), jnp.float32),
        grid_spec=grid_spec,
        compiler_params=pltpu.CompilerParams(
            dimension_semantics=("parallel",),     # no carry -> megacore-friendly
            vmem_limit_bytes=32 * 1024 * 1024),
        cost_estimate=cost,
    )(labels2d, logsm, w_wide)

    return jnp.sum(partials) / n


def conf_mat_forward_ref(labels, logsoftmax, b, theta):
    """Pure-JAX reference mirroring the PyTorch forward (est_cr=True, reweight=False)."""
    labels = labels.astype(jnp.float32)
    rho = jax.nn.softplus(b)
    cm = rho / jnp.sum(rho, axis=-1, keepdims=True)
    cr = jax.nn.sigmoid(theta)
    preds_true = jnp.exp(logsoftmax)
    m = labels.shape[1]
    losses = []
    busy = None
    for i in range(m):
        intrinsic = preds_true @ cm[i]
        if i == 0:
            busy = intrinsic
            pu = intrinsic
        else:
            pu = busy * cr[i] + intrinsic * (1.0 - cr[i])
        clipped = jnp.clip(pu, 1e-10, 0.9999999)
        losses.append(jnp.sum(-labels[:, i, :] * jnp.log(clipped), axis=1))
    L = jnp.stack(losses, axis=1)            # (n, m)
    L = L * jnp.sum(labels, axis=2)          # has_labels mask
    return jnp.mean(jnp.sum(L, axis=1))


def _make_inputs(key, n, m, k):
    k1, k2, k3 = jax.random.split(key, 3)
    label_ids = jax.random.randint(k1, (n, m), 0, k)
    labels_f32 = jax.nn.one_hot(label_ids, k, dtype=jnp.float32)
    abstain = (jax.random.uniform(k3, (n, m)) < 0.2).astype(jnp.float32)
    labels_f32 = labels_f32 * (1.0 - abstain)[:, :, None]   # zero rows = missing
    labels_bf16 = labels_f32.astype(jnp.bfloat16)            # lossless 0/1
    logits = jax.random.normal(k2, (n, k), dtype=jnp.float32)
    logsoftmax = jax.nn.log_softmax(logits, axis=-1)
    return labels_f32, labels_bf16, logsoftmax


if __name__ == "__main__":
    # Small shapes implied by the forward: n samples, m labellers, k classes.
    m, k = 3, 4

    # Deterministic parameter init (matches __init__ with conf_init=None, est_cr=True).
    b = jnp.asarray(
        np.stack([6.0 * np.eye(k) - 5.0 for _ in range(m)]), dtype=jnp.float32)
    theta = jnp.asarray(np.ones(m) * -5.0, dtype=jnp.float32)

    key = jax.random.PRNGKey(0)
    ka, kb = jax.random.split(key)

    # Test 1: tiny single-tile case.
    n = 8
    labels_f32, labels_bf16, logsoftmax = _make_inputs(ka, n, m, k)
    out = conf_mat_forward(labels_bf16, logsoftmax, b, theta)
    out = jax.block_until_ready(out)
    ref = conf_mat_forward_ref(labels_f32, logsoftmax, b, theta)
    np.testing.assert_allclose(np.asarray(out), np.asarray(ref),
                               rtol=2e-4, atol=1e-5)

    # Test 2: multi-tile path (padding + cross-tile accumulation in the wrapper).
    n2 = 1000
    labels2_f32, labels2_bf16, logsoftmax2 = _make_inputs(kb, n2, m, k)
    out2 = conf_mat_forward(labels2_bf16, logsoftmax2, b, theta, tn_max=256)
    out2 = jax.block_until_ready(out2)
    ref2 = conf_mat_forward_ref(labels2_f32, logsoftmax2, b, theta)
    np.testing.assert_allclose(np.asarray(out2), np.asarray(ref2),
                               rtol=2e-4, atol=1e-5)

    # TODO(synk): the `reweight` branch (GAMMA+*/BOTH heuristics) is no-grad,
    # host-side scalar logic in the original module; not implemented in-kernel
    # (module default reweight=False).
    print("KERNEL_OK")
</pallas_src>

<mosaic_0001>
module attributes {stable_mosaic.version = 11 : i64} {
  func.func @confmat_kernel(%arg0: i32, %arg1: memref<16x12xbf16, #tpu.memory_space<vmem>>, %arg2: memref<16x4xf32, #tpu.memory_space<vmem>>, %arg3: memref<4x12xf32, #tpu.memory_space<vmem>>, %arg4: memref<8x12xf32, #tpu.memory_space<vmem>>) attributes {dimension_semantics = [#tpu.dimension_semantics<parallel>], iteration_bounds = array<i64: 1>, scalar_prefetch = 0 : i64, scratch_operands = 0 : i64, tpu.core_type = #tpu.core_type<tc>, window_params = [{transform_indices = @transform_0, window_bounds = array<i64: 16, 12>}, {transform_indices = @transform_1, window_bounds = array<i64: 16, 4>}, {pipeline_mode = #tpu.pipeline_mode<synchronous>, transform_indices = @transform_2, window_bounds = array<i64: 4, 12>}, {transform_indices = @transform_3, window_bounds = array<i64: 8, 12>}]} {
    %c0 = arith.constant 0 : index
    %c0_0 = arith.constant 0 : index
    %0 = vector.load %arg1[%c0, %c0_0] : memref<16x12xbf16, #tpu.memory_space<vmem>>, vector<16x12xbf16>
    %1 = arith.extf %0 : vector<16x12xbf16> to vector<16x12xf32>
    %c0_1 = arith.constant 0 : index
    %c0_2 = arith.constant 0 : index
    %2 = vector.load %arg2[%c0_1, %c0_2] : memref<16x4xf32, #tpu.memory_space<vmem>>, vector<16x4xf32>
    %3 = math.exp %2 : vector<16x4xf32>
    %c0_3 = arith.constant 0 : index
    %c0_4 = arith.constant 0 : index
    %4 = vector.load %arg3[%c0_3, %c0_4] : memref<4x12xf32, #tpu.memory_space<vmem>>, vector<4x12xf32>
    %cst = arith.constant dense<0.000000e+00> : vector<16x12xf32>
    %5 = tpu.matmul %3, %4, %cst {dimension_numbers = #tpu.dot_dimension_numbers<[1], [0], [0], [1], [0, 0, 1, 1], [], []>} : vector<16x4xf32>, vector<4x12xf32>, vector<16x12xf32> -> vector<16x12xf32>
    %cst_5 = arith.constant 1.000000e-10 : f32
    %cst_6 = arith.constant 0.99999988 : f32
    %6 = vector.broadcast %cst_5 : f32 to vector<16x12xf32>
    %7 = arith.maximumf %6, %5 : vector<16x12xf32>
    %8 = vector.broadcast %cst_6 : f32 to vector<16x12xf32>
    %9 = arith.minimumf %8, %7 : vector<16x12xf32>
    %cst_7 = arith.constant 0.000000e+00 : f32
    %10 = vector.broadcast %cst_7 : f32 to vector<16x12xf32>
    %11 = arith.subf %10, %1 : vector<16x12xf32>
    %12 = math.log %9 : vector<16x12xf32>
    %13 = arith.mulf %11, %12 : vector<16x12xf32>
    %cst_8 = arith.constant dense<0.000000e+00> : vector<12xf32>
    %14 = vector.multi_reduction <add>, %13, %cst_8 [0] : vector<16x12xf32> to vector<12xf32>
    %15 = vector.shape_cast %14 : vector<12xf32> to vector<1x12xf32>
    %16 = tpu.iota {dimensions = array<i32: 0>} : vector<8x12xi32>
    %c0_i32 = arith.constant 0 : i32
    %17 = vector.broadcast %c0_i32 : i32 to vector<8x12xi32>
    %18 = arith.cmpi eq, %16, %17 : vector<8x12xi32>
    %cst_9 = arith.constant 0.000000e+00 : f32
    %19 = vector.shape_cast %15 : vector<1x12xf32> to vector<1x12xf32>
    %20 = vector.broadcast %19 : vector<1x12xf32> to vector<8x12xf32>
    %21 = vector.broadcast %cst_9 : f32 to vector<8x12xf32>
    %22 = arith.select %18, %20, %21 : vector<8x12xi1>, vector<8x12xf32>
    %c0_10 = arith.constant 0 : index
    %c0_11 = arith.constant 0 : index
    %23 = vector.load %arg4[%c0_10, %c0_11] : memref<8x12xf32, #tpu.memory_space<vmem>>, vector<8x12xf32>
    tpu.vector_store %arg4[%c0_10, %c0_11], %22 {strides = array<i32>} : memref<8x12xf32, #tpu.memory_space<vmem>>, vector<8x12xf32>,
    return
  }
  func.func @transform_0(%arg0: i32) -> (i32, i32) {
    %c0_i32 = arith.constant 0 : i32
    %c0_i32_0 = arith.constant 0 : i32
    return %arg0, %c0_i32 : i32, i32
  }
  func.func @transform_1(%arg0: i32) -> (i32, i32) {
    %c0_i32 = arith.constant 0 : i32
    %c0_i32_0 = arith.constant 0 : i32
    return %arg0, %c0_i32 : i32, i32
  }
  func.func @transform_2(%arg0: i32) -> (i32, i32) {
    %c0_i32 = arith.constant 0 : i32
    %c0_i32_0 = arith.constant 0 : i32
    %c0_i32_1 = arith.constant 0 : i32
    return %c0_i32, %c0_i32_0 : i32, i32
  }
  func.func @transform_3(%arg0: i32) -> (i32, i32) {
    %c0_i32 = arith.constant 0 : i32
    %c0_i32_0 = arith.constant 0 : i32
    return %arg0, %c0_i32 : i32, i32
  }
}

</mosaic_0001>

<bundles_post_ra>
// kernel: tpu_custom_call.1
= control target key start
LH: loop header
LB: loop body
LE: loop exit
PB: predicated region body
PF: predicated region fallthrough
CT: control target
= control target key end

     0   :  { %vm33_vm0 = vcmask 1043456   ;;  %s249_s0 = inlined_call_operand.vmem [shape: bf16[16,12], index: 0, kind: input, shape index: {}]   ;;  %s250_s1 = inlined_call_operand.vmem [shape: f32[16,4], index: 1, kind: input, shape index: {}]   ;;  %s251_s2 = inlined_call_operand.vmem [shape: f32[4,12], index: 2, kind: input, shape index: {}]   ;;  %s252_s3 = inlined_call_operand.hbm [shape: f32[8,12], index: 3, kind: output, shape index: {}]  }
   0x1   :  { %v25_v0 = vld [vmem:[%s251_s2] sm:$0xf]  ;;  %v20_v2 = vld [vmem:[%s250_s1 + $0x8] sm:$0xff] }
   0x2   :  { %v19_v1 = vld [vmem:[%s250_s1] sm:$0xff]  ;;  %163 = vmatprep.subr.msk.mxu0 %vm33_vm0, %v25_v0  ;;  %v23_v4 = vmul.f32 1.442695, %v20_v2 }
   0x3   :  { %v21_v3 = vmul.f32 1.442695, %v19_v1  ;;  %164 = vmatpush3.msk.msra.mxu0 %vm33_vm0, %v25_v0 }
   0x4   :  { %8 = vsyncpa [#allocation3], 0  ;;  %vm26_vm1 = vcmask 31744   ;;  %v157_v13 = vld [vmem:[%s249_s0] sm:$0xff]   ;;  %vm124_vm2 = vcmask 97280   ;;  %v134_v28 = vlaneseq  ;;  %s201_s0 = smov [#allocation2]  }
   0x5   :  { %169 = vpow2.f32 %v21_v3  ;;  %v159_v14 = vunpack.c.h.bf16 %v157_v13  ;;  %v158_v15 = vunpack.c.l.bf16 %v157_v13  ;;  %s145_s18 = sshll.u32 %s201_s0, 4  ;;  %s146_s18 = int_to_ptr.vmem [resolvable:$true] %s145_s18 }
   0x6   :  { %171 = vpow2.f32 %v23_v4  ;;  %v135_v31 = vshrl.u32 %v134_v28, 7  ;;  %s177_s19 = scalar_lea.vmem %s146_s18, 128  ;;  %p182_p1 = scmp.lt.s32.totalorder %s146_s18, %s146_s18 }
   0x7   :  { %v117_v16 = vsub.f32 0.0, %v159_v14  ;;  %v116_v18 = vsub.f32 0.0, %v158_v15  ;;  %p178_p0 = scmp.ne.s32.totalorder %s146_s18, %s177_s19  ;;  %p183_p2 = scmp.lt.s32.totalorder %s177_s19, %s177_s19 }
   0x8   :  { %vm136_vm3 = vcmp.eq.s32.totalorder %v135_v31, 0 }
   0x9   :  { %p184_p3 = por %p183_p2, %p182_p1 }
   0xb   :  { %p185_p4 = pnand %p184_p3, %p178_p0 }
   0xf   :  { %v170_v5 = vpop.eup %169 }
  0x10   :  { %v172_v6 = vpop.eup %171  ;;  %165 = vmatprep.mubr.msk.f32.mxu0 %vm26_vm1, %v170_v5 }
  0x11   :  { %166 = vmatmul.mubr.msk.f32.vlgmr.msra.gmra.mrb[0].mxu0 %vm26_vm1, %v172_v6 }
  0xe4   :  { %v167_v7 = vpop.f32.mrb[0].mxu0 }
  0xe5   :  { %v113_v8 = vmax.f32 %v167_v7, 1e-10  ;;  %v103_v9 = vpop.f32.mrb[1].mxu0 }
  0xe6   :  { %v112_v10 = vmax.f32 %v103_v9, 1e-10 }
  0xe7   :  { %v115_v11 = vmin.f32 %v113_v8, 0.9999999 }
  0xe8   :  { %v114_v12 = vmin.f32 %v112_v10, 0.9999999 }
  0xe9   :  { %173 = vlog2.f32 %v115_v11 }
  0xea   :  { %175 = vlog2.f32 %v114_v12 }
  0xf3   :  { %v174_v17 = vpop.eup %173 }
  0xf4   :  { %v176_v19 = vpop.eup %175  ;;  %v121_v20 = vmul.f32 0.6931472, %v174_v17 }
  0xf5   :  { %v119_v21 = vmul.f32 0.6931472, %v176_v19 }
  0xf6   :  { %v123_v22 = vmul.f32 %v121_v20, %v117_v16 }
  0xf7   :  { %v122_v23 = vmul.f32 %v119_v21, %v116_v18 }
  0xf8   :  { %v126_v24 = vsel %vm124_vm2, %v123_v22, 0.0 }
  0xf9   :  { %v125_v25 = vsel %vm124_vm2, %v122_v23, 0.0 }
  0xfa   :  { %v127_v26 = vadd.f32 %v126_v24, %v125_v25 }
  0xfc   :  { %v128_v27 = vrot.slane %v127_v26, 4 }
  0xfe   :  { %v129_v29 = vadd.f32 %v128_v27, %v127_v26 }
 0x100   :  { %v130_v30 = vrot.slane %v129_v29, 2 }
 0x102   :  { %v131_v32 = vadd.f32 %v130_v30, %v129_v29 }
 0x104   :  { %v132_v33 = vrot.slane %v131_v32, 1 }
 0x106   :  { %v133_v34 = vadd.f32 %v132_v33, %v131_v32 }
 0x108   :  { %v137_v35 = vsel %vm136_vm3, %v133_v34, 0.0 }
 0x109   :  { %138 = vst.msk [vmem:[#allocation2] sm:$0xff] %vm124_vm2, %v137_v35 }
 0x10a   :  { %188 = shalt.err (!%p185_p4)
}
 0x10b   :  { %s189_s22 = scalar_lea.hbm %s252_s3, 128 }
 0x10c   :  { %p190_p5 = scmp.ne.s32.totalorder %s252_s3, %s189_s22  ;;  %p193_p6 = scmp.lt.u32.totalorder %s189_s22, %s252_s3 }
 0x10e   :  { %p195_p7 = pnand %p193_p6, %p190_p5 }
 0x110   :  { %198 = shalt.err (!%p195_p7)
}
 0x111   :  { %148 = dma.vmem_to_hbm [thread:$0]  %s146_s18, 128, %s252_s3, [#allocation3]  }
 0x112   :  { %199 = dma.done.wait [#allocation3], 128  }
 0x113   :  { %200 = vsyncadd [#allocation3], 4294967168 }
 0x114   :  { %152 = vsyncpa [#allocation3], 1 }

</bundles_post_ra>
